<compile_context>
chip_gen: v7x
topology: tpu7x:2x2x1
jax: 0.10.0
libtpu: 0.0.40
codegen_flags: <defaults>
</compile_context>

<pallas_src>
import functools

import jax
import jax.numpy as jnp
from jax.experimental import pallas as pl
from jax.experimental.pallas import tpu as pltpu

LANE = 128
_NUM_STATS = 12
_NCORES = 2                 # v7x dual-TensorCore split; serializes harmlessly on v5e/v6e
_DEFAULT_TILE_ROWS = 512    # 512*128*4B = 256 KiB per f32 input block
# stat slots:
# 0:sum_x  1:count_x  2:sum_x2   3:sum_y  4:count_y  5:sum_y2
# 6:count_both 7:sum_x_both 8:sum_y_both 9:sum_xy_both 10:sum_x2_both 11:sum_y2_both


def _round_up(v, m):
    return ((v + m - 1) // m) * m


def _ccc_stats_kernel(x_ref, y_ref, out_ref, *, tile_rows, steps_per_core,
                      total_rows):
    j = pl.program_id(1)

    @pl.when(j == 0)
    def _init():
        out_ref[...] = jnp.zeros_like(out_ref)

    # Global row offset of this block (unclamped: used only for tail masking).
    step = pl.program_id(0) * steps_per_core + j
    row0 = step * tile_rows

    xf = x_ref[...].astype(jnp.float32)
    yf = y_ref[...].astype(jnp.float32)

    row_idx = row0 + jax.lax.broadcasted_iota(jnp.int32, (tile_rows, LANE), 0)
    valid = row_idx < total_rows

    fx = jnp.logical_and(valid, xf == xf)    # non-NaN (and in-bounds) input mask
    fy = jnp.logical_and(valid, yf == yf)
    fxf = fx.astype(jnp.float32)
    fyf = fy.astype(jnp.float32)
    xz = jnp.where(fx, xf, 0.0)
    yz = jnp.where(fy, yf, 0.0)
    xx = xz * xz
    yy = yz * yz

    stats = (
        xz,            # 0: sum x         (x finite)
        fxf,           # 1: count x
        xx,            # 2: sum x^2       (x finite)
        yz,            # 3: sum y         (y finite)
        fyf,           # 4: count y
        yy,            # 5: sum y^2       (y finite)
        fxf * fyf,     # 6: count both
        xz * fyf,      # 7: sum x         (both finite)
        yz * fxf,      # 8: sum y         (both finite)
        xz * yz,       # 9: sum x*y       (both finite)
        xx * fyf,      # 10: sum x^2      (both finite)
        yy * fxf,      # 11: sum y^2      (both finite)
    )

    g = tile_rows // 8
    for k, v in enumerate(stats):
        # Reduce only the leading (non-tiled) axis: pure VPU vreg adds; the
        # cross-lane/sublane reduce to scalars is done once in JAX afterwards.
        partial = jnp.sum(v.reshape(g, 8, LANE), axis=0)
        out_ref[0, k, :, :] = out_ref[0, k, :, :] + partial


def ccc_loss(pred, target, *, tile_rows=_DEFAULT_TILE_ROWS):
    """1 - CCC(pred, target), nan-aware, via a Pallas reduction kernel."""
    if not jnp.issubdtype(pred.dtype, jnp.floating):
        pred = pred.astype(jnp.float32)
    if not jnp.issubdtype(target.dtype, jnp.floating):
        target = target.astype(jnp.float32)

    x = jnp.ravel(pred)
    y = jnp.ravel(target)
    assert x.shape == y.shape
    n = x.shape[0]

    pad = (-n) % LANE
    if pad:
        # TODO(synk): copy-free path for numel % 128 != 0 (tile the original
        # trailing dim directly instead of padding the flat view).
        x = jnp.concatenate([x, jnp.full((pad,), jnp.nan, dtype=x.dtype)])
        y = jnp.concatenate([y, jnp.full((pad,), jnp.nan, dtype=y.dtype)])
    rows = (n + pad) // LANE
    x2 = x.reshape(rows, LANE)   # free reshape when no pad was needed
    y2 = y.reshape(rows, LANE)

    tr = max(8, min(_round_up(tile_rows, 8), _round_up(rows, 8)))
    steps_total = pl.cdiv(rows, tr)
    spc = pl.cdiv(steps_total, _NCORES)

    def in_map(c, j):
        # Clamp so an over-provisioned (core, step) never targets an OOB block;
        # the in-kernel row mask zeroes its contribution.
        return (jnp.minimum(c * spc + j, steps_total - 1), 0)

    kernel = functools.partial(
        _ccc_stats_kernel, tile_rows=tr, steps_per_core=spc, total_rows=rows)

    slab = pl.pallas_call(
        kernel,
        out_shape=jax.ShapeDtypeStruct((_NCORES, _NUM_STATS, 8, LANE),
                                       jnp.float32),
        grid_spec=pltpu.PrefetchScalarGridSpec(
            num_scalar_prefetch=0,
            grid=(_NCORES, spc),
            in_specs=[
                pl.BlockSpec((tr, LANE), in_map),
                pl.BlockSpec((tr, LANE), in_map),
            ],
            out_specs=pl.BlockSpec((1, _NUM_STATS, 8, LANE),
                                   lambda c, j: (c, 0, 0, 0)),
        ),
        compiler_params=pltpu.CompilerParams(
            dimension_semantics=("parallel", "arbitrary")),
    )(x2, y2)

    s = jnp.sum(slab, axis=(0, 2, 3))   # (12,) final cross-lane reduce in JAX
    sx, nxc, sxx, sy, nyc, syy, nbc, sxb, syb, sxyb, sxxb, syyb = (
        s[k] for k in range(_NUM_STATS))

    # th.nanmean(input), th.nanmean(target)
    mean_x = sx / nxc
    mean_y = sy / nyc
    # th.nanmean((input - mean)^2)  (raw-moment form)
    var_x = sxx / nxc - mean_x * mean_x
    var_y = syy / nyc - mean_y * mean_y

    # nan-aware global Pearson r over positions where both are finite
    mxb = sxb / nbc
    myb = syb / nbc
    cov_b = sxyb / nbc - mxb * myb
    var_xb = sxxb / nbc - mxb * mxb
    var_yb = syyb / nbc - myb * myb
    pearson_r = cov_b / (jnp.sqrt(var_xb) * jnp.sqrt(var_yb))

    ccc = (2.0 * pearson_r * jnp.sqrt(var_x) * jnp.sqrt(var_y)
           / (var_x + var_y + (mean_x - mean_y) ** 2))
    return 1.0 - ccc


def ccc_loss_ref(pred, target):
    """Pure-JAX reference (mirrors torch.nanmean semantics)."""
    x = jnp.ravel(pred).astype(jnp.float32)
    y = jnp.ravel(target).astype(jnp.float32)
    nx = ~jnp.isnan(x)
    ny = ~jnp.isnan(y)
    nb = nx & ny
    cx = jnp.sum(nx.astype(jnp.float32))
    cy = jnp.sum(ny.astype(jnp.float32))
    cb = jnp.sum(nb.astype(jnp.float32))
    mx = jnp.sum(jnp.where(nx, x, 0.0)) / cx
    my = jnp.sum(jnp.where(ny, y, 0.0)) / cy
    vx = jnp.sum(jnp.where(nx, (x - mx) ** 2, 0.0)) / cx
    vy = jnp.sum(jnp.where(ny, (y - my) ** 2, 0.0)) / cy
    mxb = jnp.sum(jnp.where(nb, x, 0.0)) / cb
    myb = jnp.sum(jnp.where(nb, y, 0.0)) / cb
    cov = jnp.sum(jnp.where(nb, (x - mxb) * (y - myb), 0.0)) / cb
    vxb = jnp.sum(jnp.where(nb, (x - mxb) ** 2, 0.0)) / cb
    vyb = jnp.sum(jnp.where(nb, (y - myb) ** 2, 0.0)) / cb
    r = cov / (jnp.sqrt(vxb) * jnp.sqrt(vyb))
    ccc = 2.0 * r * jnp.sqrt(vx) * jnp.sqrt(vy) / (vx + vy + (mx - my) ** 2)
    return 1.0 - ccc


if __name__ == "__main__":
    key = jax.random.PRNGKey(0)
    k1, k2, k3, k4 = jax.random.split(key, 4)

    # Case 1: (2, 4, 16, 16) -> 2048 elems (multiple of 128: copy-free path).
    shape1 = (2, 4, 16, 16)
    x1 = jax.random.normal(k1, shape1, dtype=jnp.float32)
    y1 = 0.7 * x1 + 0.3 * jax.random.normal(k2, shape1, dtype=jnp.float32)
    x1 = x1.at[0, 1, 2, 3].set(jnp.nan).at[1, 3, 8, 9].set(jnp.nan)
    y1 = y1.at[1, 0, 15, 15].set(jnp.nan)

    loss1 = jax.block_until_ready(ccc_loss(x1, y1))
    ref1 = ccc_loss_ref(x1, y1)
    assert bool(jnp.isfinite(loss1)), f"non-finite loss: {loss1}"
    assert abs(float(loss1) - float(ref1)) < 2e-4, (float(loss1), float(ref1))

    # Case 2: (6, 200) -> 1200 elems (not a multiple of 128: NaN-pad fallback).
    shape2 = (6, 200)
    x2 = jax.random.normal(k3, shape2, dtype=jnp.float32)
    y2 = 0.5 * x2 + 0.5 * jax.random.normal(k4, shape2, dtype=jnp.float32)
    x2 = x2.at[0, 3].set(jnp.nan).at[2, 17].set(jnp.nan)
    y2 = y2.at[5, 100].set(jnp.nan)

    loss2 = jax.block_until_ready(ccc_loss(x2, y2))
    ref2 = ccc_loss_ref(x2, y2)
    assert bool(jnp.isfinite(loss2)), f"non-finite loss: {loss2}"
    assert abs(float(loss2) - float(ref2)) < 2e-4, (float(loss2), float(ref2))

    print("KERNEL_OK")
</pallas_src>

<mosaic_0001>
module attributes {stable_mosaic.version = 11 : i64} {
  func.func @_ccc_stats_kernel(%arg0: i32, %arg1: i32, %arg2: memref<16x128xf32, #tpu.memory_space<vmem>>, %arg3: memref<16x128xf32, #tpu.memory_space<vmem>>, %arg4: memref<1x12x8x128xf32, #tpu.memory_space<vmem>>) attributes {dimension_semantics = [#tpu.dimension_semantics<parallel>, #tpu.dimension_semantics<arbitrary>], iteration_bounds = array<i64: 2, 1>, scalar_prefetch = 0 : i64, scratch_operands = 0 : i64, tpu.core_type = #tpu.core_type<tc>, window_params = [{transform_indices = @transform_0, window_bounds = array<i64: 16, 128>}, {transform_indices = @transform_1, window_bounds = array<i64: 16, 128>}, {transform_indices = @transform_2, window_bounds = array<i64: 1, 12, 8, 128>}]} {
    %c0_i32 = arith.constant 0 : i32
    %0 = arith.cmpi eq, %arg1, %c0_i32 : i32
    %1 = arith.extui %0 : i1 to i32
    %c0_i32_0 = arith.constant 0 : i32
    %2 = arith.cmpi ne, %1, %c0_i32_0 : i32
    scf.if %2 {
      %cst_103 = arith.constant 0.000000e+00 : f32
      %129 = vector.broadcast %cst_103 : f32 to vector<1x12x8x128xf32>
      %c0_104 = arith.constant 0 : index
      %c0_105 = arith.constant 0 : index
      %c0_106 = arith.constant 0 : index
      %c0_107 = arith.constant 0 : index
      %130 = vector.load %arg4[%c0_104, %c0_105, %c0_106, %c0_107] : memref<1x12x8x128xf32, #tpu.memory_space<vmem>>, vector<1x12x8x128xf32>
      tpu.vector_store %arg4[%c0_104, %c0_105, %c0_106, %c0_107], %129 {strides = array<i32>} : memref<1x12x8x128xf32, #tpu.memory_space<vmem>>, vector<1x12x8x128xf32>,
    } else {
    }
    %c1_i32 = arith.constant 1 : i32
    %3 = arith.muli %arg0, %c1_i32 : i32
    %4 = arith.addi %3, %arg1 : i32
    %c16_i32 = arith.constant 16 : i32
    %5 = arith.muli %4, %c16_i32 : i32
    %c0 = arith.constant 0 : index
    %c0_1 = arith.constant 0 : index
    %6 = vector.load %arg2[%c0, %c0_1] : memref<16x128xf32, #tpu.memory_space<vmem>>, vector<16x128xf32>
    %c0_2 = arith.constant 0 : index
    %c0_3 = arith.constant 0 : index
    %7 = vector.load %arg3[%c0_2, %c0_3] : memref<16x128xf32, #tpu.memory_space<vmem>>, vector<16x128xf32>
    %8 = tpu.iota {dimensions = array<i32: 0>} : vector<16x128xi32>
    %9 = vector.broadcast %5 : i32 to vector<16x128xi32>
    %10 = arith.addi %9, %8 : vector<16x128xi32>
    %c16_i32_4 = arith.constant 16 : i32
    %11 = vector.broadcast %c16_i32_4 : i32 to vector<16x128xi32>
    %12 = arith.cmpi slt, %10, %11 : vector<16x128xi32>
    %13 = arith.cmpf oeq, %6, %6 : vector<16x128xf32>
    %14 = arith.andi %12, %13 : vector<16x128xi1>
    %15 = arith.cmpf oeq, %7, %7 : vector<16x128xf32>
    %16 = arith.andi %12, %15 : vector<16x128xi1>
    %17 = arith.extui %14 : vector<16x128xi1> to vector<16x128xi32>
    %18 = arith.sitofp %17 : vector<16x128xi32> to vector<16x128xf32>
    %19 = arith.extui %16 : vector<16x128xi1> to vector<16x128xi32>
    %20 = arith.sitofp %19 : vector<16x128xi32> to vector<16x128xf32>
    %cst = arith.constant 0.000000e+00 : f32
    %21 = vector.broadcast %cst : f32 to vector<16x128xf32>
    %22 = arith.select %14, %6, %21 : vector<16x128xi1>, vector<16x128xf32>
    %cst_5 = arith.constant 0.000000e+00 : f32
    %23 = vector.broadcast %cst_5 : f32 to vector<16x128xf32>
    %24 = arith.select %16, %7, %23 : vector<16x128xi1>, vector<16x128xf32>
    %25 = arith.mulf %22, %22 : vector<16x128xf32>
    %26 = arith.mulf %24, %24 : vector<16x128xf32>
    %27 = arith.mulf %18, %20 : vector<16x128xf32>
    %28 = arith.mulf %22, %20 : vector<16x128xf32>
    %29 = arith.mulf %24, %18 : vector<16x128xf32>
    %30 = arith.mulf %22, %24 : vector<16x128xf32>
    %31 = arith.mulf %25, %20 : vector<16x128xf32>
    %32 = arith.mulf %26, %18 : vector<16x128xf32>
    %33 = vector.shape_cast %22 : vector<16x128xf32> to vector<2x8x128xf32>
    %cst_6 = arith.constant dense<0.000000e+00> : vector<8x128xf32>
    %34 = vector.multi_reduction <add>, %33, %cst_6 [0] : vector<2x8x128xf32> to vector<8x128xf32>
    %c0_7 = arith.constant 0 : index
    %c0_8 = arith.constant 0 : index
    %c0_9 = arith.constant 0 : index
    %c0_10 = arith.constant 0 : index
    %35 = vector.load %arg4[%c0_7, %c0_8, %c0_9, %c0_10] : memref<1x12x8x128xf32, #tpu.memory_space<vmem>>, vector<1x1x8x128xf32>
    %36 = vector.shape_cast %35 : vector<1x1x8x128xf32> to vector<8x128xf32>
    %37 = arith.addf %36, %34 : vector<8x128xf32>
    %c0_11 = arith.constant 0 : index
    %c0_12 = arith.constant 0 : index
    %c0_13 = arith.constant 0 : index
    %c0_14 = arith.constant 0 : index
    %38 = vector.load %arg4[%c0_11, %c0_12, %c0_13, %c0_14] : memref<1x12x8x128xf32, #tpu.memory_space<vmem>>, vector<1x1x8x128xf32>
    %39 = vector.shape_cast %38 : vector<1x1x8x128xf32> to vector<8x128xf32>
    %40 = vector.shape_cast %37 : vector<8x128xf32> to vector<1x1x8x128xf32>
    tpu.vector_store %arg4[%c0_11, %c0_12, %c0_13, %c0_14], %40 {strides = array<i32>} : memref<1x12x8x128xf32, #tpu.memory_space<vmem>>, vector<1x1x8x128xf32>,
    %41 = vector.shape_cast %18 : vector<16x128xf32> to vector<2x8x128xf32>
    %cst_15 = arith.constant dense<0.000000e+00> : vector<8x128xf32>
    %42 = vector.multi_reduction <add>, %41, %cst_15 [0] : vector<2x8x128xf32> to vector<8x128xf32>
    %c0_16 = arith.constant 0 : index
    %c1 = arith.constant 1 : index
    %c0_17 = arith.constant 0 : index
    %c0_18 = arith.constant 0 : index
    %43 = vector.load %arg4[%c0_16, %c1, %c0_17, %c0_18] : memref<1x12x8x128xf32, #tpu.memory_space<vmem>>, vector<1x1x8x128xf32>
    %44 = vector.shape_cast %43 : vector<1x1x8x128xf32> to vector<8x128xf32>
    %45 = arith.addf %44, %42 : vector<8x128xf32>
    %c0_19 = arith.constant 0 : index
    %c1_20 = arith.constant 1 : index
    %c0_21 = arith.constant 0 : index
    %c0_22 = arith.constant 0 : index
    %46 = vector.load %arg4[%c0_19, %c1_20, %c0_21, %c0_22] : memref<1x12x8x128xf32, #tpu.memory_space<vmem>>, vector<1x1x8x128xf32>
    %47 = vector.shape_cast %46 : vector<1x1x8x128xf32> to vector<8x128xf32>
    %48 = vector.shape_cast %45 : vector<8x128xf32> to vector<1x1x8x128xf32>
    tpu.vector_store %arg4[%c0_19, %c1_20, %c0_21, %c0_22], %48 {strides = array<i32>} : memref<1x12x8x128xf32, #tpu.memory_space<vmem>>, vector<1x1x8x128xf32>,
    %49 = vector.shape_cast %25 : vector<16x128xf32> to vector<2x8x128xf32>
    %cst_23 = arith.constant dense<0.000000e+00> : vector<8x128xf32>
    %50 = vector.multi_reduction <add>, %49, %cst_23 [0] : vector<2x8x128xf32> to vector<8x128xf32>
    %c0_24 = arith.constant 0 : index
    %c2 = arith.constant 2 : index
    %c0_25 = arith.constant 0 : index
    %c0_26 = arith.constant 0 : index
    %51 = vector.load %arg4[%c0_24, %c2, %c0_25, %c0_26] : memref<1x12x8x128xf32, #tpu.memory_space<vmem>>, vector<1x1x8x128xf32>
    %52 = vector.shape_cast %51 : vector<1x1x8x128xf32> to vector<8x128xf32>
    %53 = arith.addf %52, %50 : vector<8x128xf32>
    %c0_27 = arith.constant 0 : index
    %c2_28 = arith.constant 2 : index
    %c0_29 = arith.constant 0 : index
    %c0_30 = arith.constant 0 : index
    %54 = vector.load %arg4[%c0_27, %c2_28, %c0_29, %c0_30] : memref<1x12x8x128xf32, #tpu.memory_space<vmem>>, vector<1x1x8x128xf32>
    %55 = vector.shape_cast %54 : vector<1x1x8x128xf32> to vector<8x128xf32>
    %56 = vector.shape_cast %53 : vector<8x128xf32> to vector<1x1x8x128xf32>
    tpu.vector_store %arg4[%c0_27, %c2_28, %c0_29, %c0_30], %56 {strides = array<i32>} : memref<1x12x8x128xf32, #tpu.memory_space<vmem>>, vector<1x1x8x128xf32>,
    %57 = vector.shape_cast %24 : vector<16x128xf32> to vector<2x8x128xf32>
    %cst_31 = arith.constant dense<0.000000e+00> : vector<8x128xf32>
    %58 = vector.multi_reduction <add>, %57, %cst_31 [0] : vector<2x8x128xf32> to vector<8x128xf32>
    %c0_32 = arith.constant 0 : index
    %c3 = arith.constant 3 : index
    %c0_33 = arith.constant 0 : index
    %c0_34 = arith.constant 0 : index
    %59 = vector.load %arg4[%c0_32, %c3, %c0_33, %c0_34] : memref<1x12x8x128xf32, #tpu.memory_space<vmem>>, vector<1x1x8x128xf32>
    %60 = vector.shape_cast %59 : vector<1x1x8x128xf32> to vector<8x128xf32>
    %61 = arith.addf %60, %58 : vector<8x128xf32>
    %c0_35 = arith.constant 0 : index
    %c3_36 = arith.constant 3 : index
    %c0_37 = arith.constant 0 : index
    %c0_38 = arith.constant 0 : index
    %62 = vector.load %arg4[%c0_35, %c3_36, %c0_37, %c0_38] : memref<1x12x8x128xf32, #tpu.memory_space<vmem>>, vector<1x1x8x128xf32>
    %63 = vector.shape_cast %62 : vector<1x1x8x128xf32> to vector<8x128xf32>
    %64 = vector.shape_cast %61 : vector<8x128xf32> to vector<1x1x8x128xf32>
    tpu.vector_store %arg4[%c0_35, %c3_36, %c0_37, %c0_38], %64 {strides = array<i32>} : memref<1x12x8x128xf32, #tpu.memory_space<vmem>>, vector<1x1x8x128xf32>,
    %65 = vector.shape_cast %20 : vector<16x128xf32> to vector<2x8x128xf32>
    %cst_39 = arith.constant dense<0.000000e+00> : vector<8x128xf32>
    %66 = vector.multi_reduction <add>, %65, %cst_39 [0] : vector<2x8x128xf32> to vector<8x128xf32>
    %c0_40 = arith.constant 0 : index
    %c4 = arith.constant 4 : index
    %c0_41 = arith.constant 0 : index
    %c0_42 = arith.constant 0 : index
    %67 = vector.load %arg4[%c0_40, %c4, %c0_41, %c0_42] : memref<1x12x8x128xf32, #tpu.memory_space<vmem>>, vector<1x1x8x128xf32>
    %68 = vector.shape_cast %67 : vector<1x1x8x128xf32> to vector<8x128xf32>
    %69 = arith.addf %68, %66 : vector<8x128xf32>
    %c0_43 = arith.constant 0 : index
    %c4_44 = arith.constant 4 : index
    %c0_45 = arith.constant 0 : index
    %c0_46 = arith.constant 0 : index
    %70 = vector.load %arg4[%c0_43, %c4_44, %c0_45, %c0_46] : memref<1x12x8x128xf32, #tpu.memory_space<vmem>>, vector<1x1x8x128xf32>
    %71 = vector.shape_cast %70 : vector<1x1x8x128xf32> to vector<8x128xf32>
    %72 = vector.shape_cast %69 : vector<8x128xf32> to vector<1x1x8x128xf32>
    tpu.vector_store %arg4[%c0_43, %c4_44, %c0_45, %c0_46], %72 {strides = array<i32>} : memref<1x12x8x128xf32, #tpu.memory_space<vmem>>, vector<1x1x8x128xf32>,
    %73 = vector.shape_cast %26 : vector<16x128xf32> to vector<2x8x128xf32>
    %cst_47 = arith.constant dense<0.000000e+00> : vector<8x128xf32>
    %74 = vector.multi_reduction <add>, %73, %cst_47 [0] : vector<2x8x128xf32> to vector<8x128xf32>
    %c0_48 = arith.constant 0 : index
    %c5 = arith.constant 5 : index
    %c0_49 = arith.constant 0 : index
    %c0_50 = arith.constant 0 : index
    %75 = vector.load %arg4[%c0_48, %c5, %c0_49, %c0_50] : memref<1x12x8x128xf32, #tpu.memory_space<vmem>>, vector<1x1x8x128xf32>
    %76 = vector.shape_cast %75 : vector<1x1x8x128xf32> to vector<8x128xf32>
    %77 = arith.addf %76, %74 : vector<8x128xf32>
    %c0_51 = arith.constant 0 : index
    %c5_52 = arith.constant 5 : index
    %c0_53 = arith.constant 0 : index
    %c0_54 = arith.constant 0 : index
    %78 = vector.load %arg4[%c0_51, %c5_52, %c0_53, %c0_54] : memref<1x12x8x128xf32, #tpu.memory_space<vmem>>, vector<1x1x8x128xf32>
    %79 = vector.shape_cast %78 : vector<1x1x8x128xf32> to vector<8x128xf32>
    %80 = vector.shape_cast %77 : vector<8x128xf32> to vector<1x1x8x128xf32>
    tpu.vector_store %arg4[%c0_51, %c5_52, %c0_53, %c0_54], %80 {strides = array<i32>} : memref<1x12x8x128xf32, #tpu.memory_space<vmem>>, vector<1x1x8x128xf32>,
    %81 = vector.shape_cast %27 : vector<16x128xf32> to vector<2x8x128xf32>
    %cst_55 = arith.constant dense<0.000000e+00> : vector<8x128xf32>
    %82 = vector.multi_reduction <add>, %81, %cst_55 [0] : vector<2x8x128xf32> to vector<8x128xf32>
    %c0_56 = arith.constant 0 : index
    %c6 = arith.constant 6 : index
    %c0_57 = arith.constant 0 : index
    %c0_58 = arith.constant 0 : index
    %83 = vector.load %arg4[%c0_56, %c6, %c0_57, %c0_58] : memref<1x12x8x128xf32, #tpu.memory_space<vmem>>, vector<1x1x8x128xf32>
    %84 = vector.shape_cast %83 : vector<1x1x8x128xf32> to vector<8x128xf32>
    %85 = arith.addf %84, %82 : vector<8x128xf32>
    %c0_59 = arith.constant 0 : index
    %c6_60 = arith.constant 6 : index
    %c0_61 = arith.constant 0 : index
    %c0_62 = arith.constant 0 : index
    %86 = vector.load %arg4[%c0_59, %c6_60, %c0_61, %c0_62] : memref<1x12x8x128xf32, #tpu.memory_space<vmem>>, vector<1x1x8x128xf32>
    %87 = vector.shape_cast %86 : vector<1x1x8x128xf32> to vector<8x128xf32>
    %88 = vector.shape_cast %85 : vector<8x128xf32> to vector<1x1x8x128xf32>
    tpu.vector_store %arg4[%c0_59, %c6_60, %c0_61, %c0_62], %88 {strides = array<i32>} : memref<1x12x8x128xf32, #tpu.memory_space<vmem>>, vector<1x1x8x128xf32>,
    %89 = vector.shape_cast %28 : vector<16x128xf32> to vector<2x8x128xf32>
    %cst_63 = arith.constant dense<0.000000e+00> : vector<8x128xf32>
    %90 = vector.multi_reduction <add>, %89, %cst_63 [0] : vector<2x8x128xf32> to vector<8x128xf32>
    %c0_64 = arith.constant 0 : index
    %c7 = arith.constant 7 : index
    %c0_65 = arith.constant 0 : index
    %c0_66 = arith.constant 0 : index
    %91 = vector.load %arg4[%c0_64, %c7, %c0_65, %c0_66] : memref<1x12x8x128xf32, #tpu.memory_space<vmem>>, vector<1x1x8x128xf32>
    %92 = vector.shape_cast %91 : vector<1x1x8x128xf32> to vector<8x128xf32>
    %93 = arith.addf %92, %90 : vector<8x128xf32>
    %c0_67 = arith.constant 0 : index
    %c7_68 = arith.constant 7 : index
    %c0_69 = arith.constant 0 : index
    %c0_70 = arith.constant 0 : index
    %94 = vector.load %arg4[%c0_67, %c7_68, %c0_69, %c0_70] : memref<1x12x8x128xf32, #tpu.memory_space<vmem>>, vector<1x1x8x128xf32>
    %95 = vector.shape_cast %94 : vector<1x1x8x128xf32> to vector<8x128xf32>
    %96 = vector.shape_cast %93 : vector<8x128xf32> to vector<1x1x8x128xf32>
    tpu.vector_store %arg4[%c0_67, %c7_68, %c0_69, %c0_70], %96 {strides = array<i32>} : memref<1x12x8x128xf32, #tpu.memory_space<vmem>>, vector<1x1x8x128xf32>,
    %97 = vector.shape_cast %29 : vector<16x128xf32> to vector<2x8x128xf32>
    %cst_71 = arith.constant dense<0.000000e+00> : vector<8x128xf32>
    %98 = vector.multi_reduction <add>, %97, %cst_71 [0] : vector<2x8x128xf32> to vector<8x128xf32>
    %c0_72 = arith.constant 0 : index
    %c8 = arith.constant 8 : index
    %c0_73 = arith.constant 0 : index
    %c0_74 = arith.constant 0 : index
    %99 = vector.load %arg4[%c0_72, %c8, %c0_73, %c0_74] : memref<1x12x8x128xf32, #tpu.memory_space<vmem>>, vector<1x1x8x128xf32>
    %100 = vector.shape_cast %99 : vector<1x1x8x128xf32> to vector<8x128xf32>
    %101 = arith.addf %100, %98 : vector<8x128xf32>
    %c0_75 = arith.constant 0 : index
    %c8_76 = arith.constant 8 : index
    %c0_77 = arith.constant 0 : index
    %c0_78 = arith.constant 0 : index
    %102 = vector.load %arg4[%c0_75, %c8_76, %c0_77, %c0_78] : memref<1x12x8x128xf32, #tpu.memory_space<vmem>>, vector<1x1x8x128xf32>
    %103 = vector.shape_cast %102 : vector<1x1x8x128xf32> to vector<8x128xf32>
    %104 = vector.shape_cast %101 : vector<8x128xf32> to vector<1x1x8x128xf32>
    tpu.vector_store %arg4[%c0_75, %c8_76, %c0_77, %c0_78], %104 {strides = array<i32>} : memref<1x12x8x128xf32, #tpu.memory_space<vmem>>, vector<1x1x8x128xf32>,
    %105 = vector.shape_cast %30 : vector<16x128xf32> to vector<2x8x128xf32>
    %cst_79 = arith.constant dense<0.000000e+00> : vector<8x128xf32>
    %106 = vector.multi_reduction <add>, %105, %cst_79 [0] : vector<2x8x128xf32> to vector<8x128xf32>
    %c0_80 = arith.constant 0 : index
    %c9 = arith.constant 9 : index
    %c0_81 = arith.constant 0 : index
    %c0_82 = arith.constant 0 : index
    %107 = vector.load %arg4[%c0_80, %c9, %c0_81, %c0_82] : memref<1x12x8x128xf32, #tpu.memory_space<vmem>>, vector<1x1x8x128xf32>
    %108 = vector.shape_cast %107 : vector<1x1x8x128xf32> to vector<8x128xf32>
    %109 = arith.addf %108, %106 : vector<8x128xf32>
    %c0_83 = arith.constant 0 : index
    %c9_84 = arith.constant 9 : index
    %c0_85 = arith.constant 0 : index
    %c0_86 = arith.constant 0 : index
    %110 = vector.load %arg4[%c0_83, %c9_84, %c0_85, %c0_86] : memref<1x12x8x128xf32, #tpu.memory_space<vmem>>, vector<1x1x8x128xf32>
    %111 = vector.shape_cast %110 : vector<1x1x8x128xf32> to vector<8x128xf32>
    %112 = vector.shape_cast %109 : vector<8x128xf32> to vector<1x1x8x128xf32>
    tpu.vector_store %arg4[%c0_83, %c9_84, %c0_85, %c0_86], %112 {strides = array<i32>} : memref<1x12x8x128xf32, #tpu.memory_space<vmem>>, vector<1x1x8x128xf32>,
    %113 = vector.shape_cast %31 : vector<16x128xf32> to vector<2x8x128xf32>
    %cst_87 = arith.constant dense<0.000000e+00> : vector<8x128xf32>
    %114 = vector.multi_reduction <add>, %113, %cst_87 [0] : vector<2x8x128xf32> to vector<8x128xf32>
    %c0_88 = arith.constant 0 : index
    %c10 = arith.constant 10 : index
    %c0_89 = arith.constant 0 : index
    %c0_90 = arith.constant 0 : index
    %115 = vector.load %arg4[%c0_88, %c10, %c0_89, %c0_90] : memref<1x12x8x128xf32, #tpu.memory_space<vmem>>, vector<1x1x8x128xf32>
    %116 = vector.shape_cast %115 : vector<1x1x8x128xf32> to vector<8x128xf32>
    %117 = arith.addf %116, %114 : vector<8x128xf32>
    %c0_91 = arith.constant 0 : index
    %c10_92 = arith.constant 10 : index
    %c0_93 = arith.constant 0 : index
    %c0_94 = arith.constant 0 : index
    %118 = vector.load %arg4[%c0_91, %c10_92, %c0_93, %c0_94] : memref<1x12x8x128xf32, #tpu.memory_space<vmem>>, vector<1x1x8x128xf32>
    %119 = vector.shape_cast %118 : vector<1x1x8x128xf32> to vector<8x128xf32>
    %120 = vector.shape_cast %117 : vector<8x128xf32> to vector<1x1x8x128xf32>
    tpu.vector_store %arg4[%c0_91, %c10_92, %c0_93, %c0_94], %120 {strides = array<i32>} : memref<1x12x8x128xf32, #tpu.memory_space<vmem>>, vector<1x1x8x128xf32>,
    %121 = vector.shape_cast %32 : vector<16x128xf32> to vector<2x8x128xf32>
    %cst_95 = arith.constant dense<0.000000e+00> : vector<8x128xf32>
    %122 = vector.multi_reduction <add>, %121, %cst_95 [0] : vector<2x8x128xf32> to vector<8x128xf32>
    %c0_96 = arith.constant 0 : index
    %c11 = arith.constant 11 : index
    %c0_97 = arith.constant 0 : index
    %c0_98 = arith.constant 0 : index
    %123 = vector.load %arg4[%c0_96, %c11, %c0_97, %c0_98] : memref<1x12x8x128xf32, #tpu.memory_space<vmem>>, vector<1x1x8x128xf32>
    %124 = vector.shape_cast %123 : vector<1x1x8x128xf32> to vector<8x128xf32>
    %125 = arith.addf %124, %122 : vector<8x128xf32>
    %c0_99 = arith.constant 0 : index
    %c11_100 = arith.constant 11 : index
    %c0_101 = arith.constant 0 : index
    %c0_102 = arith.constant 0 : index
    %126 = vector.load %arg4[%c0_99, %c11_100, %c0_101, %c0_102] : memref<1x12x8x128xf32, #tpu.memory_space<vmem>>, vector<1x1x8x128xf32>
    %127 = vector.shape_cast %126 : vector<1x1x8x128xf32> to vector<8x128xf32>
    %128 = vector.shape_cast %125 : vector<8x128xf32> to vector<1x1x8x128xf32>
    tpu.vector_store %arg4[%c0_99, %c11_100, %c0_101, %c0_102], %128 {strides = array<i32>} : memref<1x12x8x128xf32, #tpu.memory_space<vmem>>, vector<1x1x8x128xf32>,
    return
  }
  func.func @transform_0(%arg0: i32, %arg1: i32) -> (i32, i32) {
    %c1_i32 = arith.constant 1 : i32
    %0 = arith.muli %arg0, %c1_i32 : i32
    %1 = arith.addi %0, %arg1 : i32
    %c0_i32 = arith.constant 0 : i32
    %2 = arith.minsi %1, %c0_i32 : i32
    %c0_i32_0 = arith.constant 0 : i32
    %c0_i32_1 = arith.constant 0 : i32
    return %2, %c0_i32_0 : i32, i32
  }
  func.func @transform_1(%arg0: i32, %arg1: i32) -> (i32, i32) {
    %c1_i32 = arith.constant 1 : i32
    %0 = arith.muli %arg0, %c1_i32 : i32
    %1 = arith.addi %0, %arg1 : i32
    %c0_i32 = arith.constant 0 : i32
    %2 = arith.minsi %1, %c0_i32 : i32
    %c0_i32_0 = arith.constant 0 : i32
    %c0_i32_1 = arith.constant 0 : i32
    return %2, %c0_i32_0 : i32, i32
  }
  func.func @transform_2(%arg0: i32, %arg1: i32) -> (i32, i32, i32, i32) {
    %c0_i32 = arith.constant 0 : i32
    %c0_i32_0 = arith.constant 0 : i32
    %c0_i32_1 = arith.constant 0 : i32
    %c0_i32_2 = arith.constant 0 : i32
    return %arg0, %c0_i32, %c0_i32_0, %c0_i32_1 : i32, i32, i32, i32
  }
}

</mosaic_0001>

<bundles_post_ra>
// kernel: tpu_custom_call.1
= control target key start
LH: loop header
LB: loop body
LE: loop exit
PB: predicated region body
PF: predicated region fallthrough
CT: control target
= control target key end

     0   :  { %7 = vsyncpa [#allocation3], 0  ;;  %s1048_s0 = inlined_call_operand.hbm [shape: f32[16,128], index: 0, kind: input, shape index: {}]   ;;  %s1049_s1 = inlined_call_operand.hbm [shape: f32[16,128], index: 1, kind: input, shape index: {}]   ;;  %s1050_s2 = inlined_call_operand.hbm [shape: f32[2,12,8,128], index: 2, kind: output, shape index: {}]  }
   0x1   :  { %9 = vsyncpa [#allocation3 + $0x1], 0 }
   0x2   :  { %10 = vsyncpa [#allocation6], 0 }
   0x3   :  { %12 = vsyncpa [#allocation6 + $0x1], 0 }
   0x4   :  { %13 = vsyncpa [#allocation4], 0 }
   0x5   :  { %15 = vsyncpa [#allocation4 + $0x1], 0  ;;  %s818_s9 = smov 0   ;;  %s820_s10 = smov 0  }
   0x6   :  { %s822_s11 = smov 0   ;;  %s824_s12 = smov 0  }
   0x7   :  { %s826_s13 = smov 0   ;;  %s828_s14 = smov 0  }
   0x8   :  { %s830_s15 = smov 0   ;;  %s832_s16 = smov 0  }
   0x9 LB: > { %s483_s17 = sadd.s32 4294967295, %s793_s16   ;;  %s484_s18 = sadd.s32 4294967294, %s793_s16   ;;  %s793_s16 = sphi %s832_s16, %s21_s16   ;;  %s789_s15 = sphi %s830_s15, %s1069_s15   ;;  %s785_s14 = sphi %s828_s14, %s1068_s14   ;;  %s781_s13 = sphi %s826_s13, %s1038_s13   ;;  %s777_s12 = sphi %s824_s12, %s1067_s12   ;;  %s773_s11 = sphi %s822_s11, %s1066_s11   ;;  %s769_s10 = sphi %s820_s10, %s1065_s10   ;;  %s765_s9 = sphi %s818_s9, %s1064_s9  }
   0xa   : > { %s33_s19 = sadd.s32 1, %s789_s15  ;;  %p762_p1 = scmp.ne.s32.totalorder %s781_s13, 0 }
   0xb   : > { %p35_p0 = scmp.ge.s32.totalorder %s33_s19, 2  ;;  %p54_p2 = scmp.eq.s32.totalorder %s793_s16, 0 }
   0xc   : > { %p59_p3 = scmp.ne.s32.totalorder %s781_s13, %s777_s12  ;;  %p60_p5 = scmp.eq.s32.totalorder %s483_s17, 0 }
   0xd   : > { %s1071_s19 = smov (%p35_p0, %s33_s19), 0  ;;  %p864_p4 = por %p762_p1, %p54_p2 }
   0xe   : > { %p868_p6 = por %p60_p5, %p59_p3  ;;  %s101_s22 = ssub.s32 %s789_s15, %s1071_s19 }
   0xf   : > { %p102_p7 = scmp.eq.s32.totalorder %s101_s22, 0  ;;  %s104_s23 = sadd.s32 1, %s773_s11 }
  0x10   : > { %s1054_s21 = scalar_select %p868_p6, 1, 0 }
  0x11   : > { %s876_s24 = scalar_select %p102_p7, %s773_s11, %s104_s23  }
  0x12   : > { %p114_p8 = scmp.ne.s32.totalorder %s773_s11, %s769_s10  ;;  %p115_p9 = scmp.eq.s32.totalorder %s483_s17, 1 }
  0x13   : > { %p120_p10 = scmp.ne.s32.totalorder %s769_s10, %s765_s9  ;;  %p121_p11 = scmp.eq.s32.totalorder %s484_s18, 1 }
  0x14   : > { %p882_p12 = por %p115_p9, %p114_p8  ;;  %p547_p1 = scmp.lt.s32.totalorder %s793_s16, 2 }
  0x15   : > { %p887_p0 = por %p121_p11, %p120_p10  ;;  %s795_s27 = smov [#allocation2]  }
  0x16   : > { %s1055_s25 = scalar_select %p882_p12, 1, 0 }
  0x17   : > { %s1056_s26 = scalar_select %p887_p0, 1, 0 }
  0x18   : > { %s155_s28 = sshll.u32 %s795_s27, 4  ;;  %p894_p2 = pnand %p547_p1, %p864_p4  ;;  %s156_s28 = int_to_ptr.vmem [resolvable:$true] %s155_s28 }
  0x19   : > { %s626_s4 = scalar_lea.hbm %s1048_s0, 256 }
  0x1a   : > { %p627_p3 = scmp.ne.s32.totalorder %s1048_s0, %s626_s4  ;;  %p628_p5 = pneg %p894_p2 }
  0x1b   : > { %p633_p8 = scmp.lt.u32.totalorder %s626_s4, %s626_s4  ;;  %p635_p9 = scmp.lt.u32.totalorder %s626_s4, %s1048_s0 }
  0x1c   : > { %p629_p7 = pnand %p628_p5, %p627_p3 }
  0x1d   : > { %p636_p10 = por %p635_p9, %p633_p8 }
  0x1e   : > { %p630_p4 = pneg %p629_p7 }
  0x20   : > { %p637_p11 = pnand %p636_p10, %p630_p4 }
  0x22   : > { %640 = shalt.err (!%p637_p11)
}
  0x23   : > { %s641_s12 = scalar_lea.vmem %s156_s28, 256  ;;  %s648_s17 = scalar_lea.vmem %s156_s28, 512 }
  0x24   : > { %p642_p1 = scmp.ne.s32.totalorder %s156_s28, %s641_s12  ;;  %p649_p12 = scmp.lt.s32.totalorder %s156_s28, %s156_s28 }
  0x25   : > { %p650_p6 = scmp.lt.s32.totalorder %s648_s17, %s641_s12 }
  0x26   : > { %p644_p13 = pnand %p642_p1, %p628_p5 }
  0x27   : > { %p651_p3 = por %p650_p6, %p649_p12 }
  0x28   : > { %p645_p0 = pneg %p644_p13 }
  0x2a   : > { %p652_p7 = pnand %p651_p3, %p645_p0 }
  0x2c   : > { %655 = shalt.err (!%p652_p7)
}
  0x2d   : > { %s796_s18 = smov 128   ;;  %s797_s20 = smov 8  }
  0x2e   : > { %539 = dma.hbm_to_vmem [thread:$0]  (!%p894_p2), %s1048_s0, 256, %s156_s28, [#allocation3], %s796_s18, %s796_s18, %s797_s20  }
  0x2f   : > { %p493_p13 = scmp.ge.s32.totalorder %s793_s16, 1  ;;  %p187_p4 = scmp.lt.s32.totalorder %s793_s16, 3 }
  0x30   : > { %s798_s30 = smov [#allocation5]   ;;  %s656_s6 = scalar_lea.hbm %s1049_s1, 256 }
  0x31   : > { %p925_p8 = pnand %p493_p13, %p187_p4  ;;  %s179_s3 = sshll.u32 %s798_s30, 4  ;;  %s180_s3 = int_to_ptr.vmem [resolvable:$true] %s179_s3 }
  0x32   : > { %p657_p6 = scmp.ne.s32.totalorder %s1049_s1, %s656_s6  ;;  %p663_p9 = scmp.lt.u32.totalorder %s656_s6, %s656_s6 }
  0x33   : > { %s1058_s27 = scalar_select %p925_p8, 1, 0 }
  0x34   : > { %p659_p12 = pnand %p657_p6, %p628_p5  ;;  %p665_p10 = scmp.lt.u32.totalorder %s656_s6, %s1049_s1 }
  0x36   : > { %p660_p0 = pneg %p659_p12  ;;  %p666_p11 = por %p665_p10, %p663_p9 }
  0x38   : > { %p667_p1 = pnand %p666_p11, %p660_p0 }
  0x3a   : > { %670 = shalt.err (!%p667_p1)
}
  0x3b   : > { %s671_s17 = scalar_lea.vmem %s180_s3, 256  ;;  %s678_s22 = scalar_lea.vmem %s180_s3, 512 }
  0x3c   : > { %p672_p3 = scmp.ne.s32.totalorder %s180_s3, %s671_s17  ;;  %p679_p4 = scmp.lt.s32.totalorder %s180_s3, %s180_s3 }
  0x3d   : > { %p680_p8 = scmp.lt.s32.totalorder %s678_s22, %s671_s17 }
  0x3e   : > { %p674_p7 = pnand %p672_p3, %p628_p5 }
  0x3f   : > { %p681_p6 = por %p680_p8, %p679_p4 }
  0x40   : > { %p675_p13 = pneg %p674_p7 }
  0x42   : > { %p682_p12 = pnand %p681_p6, %p675_p13 }
  0x44   : > { %685 = shalt.err (!%p682_p12)
}
  0x45   : > { %542 = dma.hbm_to_vmem [thread:$0]  (!%p894_p2), %s1049_s1, 256, %s180_s3, [#allocation6], %s796_s18, %s796_s18, %s797_s20  }
  0x46   : > { %p1059_p0 = scmp.ne.s32.totalorder %s1058_s27, 0 }
  0x47   : > { %s193_s4 = sand.u32 (!%p1059_p0), 1, %s781_s13   ;;  %p1060_p5 = scmp.ne.s32.totalorder (!%p1059_p0), %s1054_s21, 0 }
  0x48   : > { %191 = sbr.rel (%p1059_p0) target bundleno = 118 (0x76), region = 28  ;;  %s494_s5 = sshll.u32 (!%p1059_p0), %s193_s4, 4 }
  0x49   : > { %s194_s6 = scalar_lea.sflag (!%p1059_p0), [#allocation3], %s193_s4  ;;  %s197_s7 = scalar_lea.vmem (!%p1059_p0), [#allocation2], %s494_s5 }
  0x4f   : > { %751 = dma.done.wait (%p1060_p5), %s194_s6, 256  }
  0x50   : > { %753 = vsyncadd (%p1060_p5), %s194_s6, 4294967040  ;;  %s203_s29 = scalar_lea.sflag [#allocation6], %s193_s4  ;;  %s206_s8 = scalar_lea.vmem [#allocation5], %s494_s5 }
  0x51   : > { %755 = dma.done.wait (%p1060_p5), %s203_s29, 256  }
  0x52   : > { %757 = vsyncadd (%p1060_p5), %s203_s29, 4294967040  ;;  %s496_s18 = sshll.u32 %s785_s14, 4  ;;  %v262_v0 = vlaneseq  ;;  %s229_s20 = sand.u32 1, %s769_s10   ;;  %v258_v6 = vld [vmem:[%s197_s7] sm:$0xff]  ;;  %v259_v7 = vld [vmem:[%s197_s7 + $0x8] sm:$0xff]  ;;  %v799_v12 = vmov 0.0  }
  0x53   : > { %v265_v1 = vstv %s496_s18  ;;  %v260_v8 = vld [vmem:[%s206_s8] sm:$0xff]  ;;  %vm270_vm2 = vcmp.eq.f32.partialorder %v258_v6, %v258_v6  ;;  %vm271_vm3 = vcmp.eq.f32.partialorder %v259_v7, %v259_v7  ;;  %v261_v9 = vld [vmem:[%s206_s8 + $0x8] sm:$0xff]  ;;  %s528_s21 = smul.u32 96, %s229_s20  ;;  %s996_s23 = scalar_lea.sflag [#allocation4], %s229_s20 }
  0x54   : > { %v263_v2 = vshrl.u32 %v262_v0, 7  ;;  %vm274_vm4 = vcmp.eq.f32.partialorder %v260_v8, %v260_v8  ;;  %vm275_vm6 = vcmp.eq.f32.partialorder %v261_v9, %v261_v9  ;;  %s529_s3 = smul.u32 1536, %s785_s14  ;;  %p1061_p8 = scmp.ne.s32.totalorder %s1055_s25, 0 }
  0x55   : > { %s971_s27 = scalar_lea.vmem [#allocation7], %s528_s21  ;;  %s800_s30 = smov [#allocation7]  }
  0x56   : > { %v264_v3 = vadd.s32 8, %v263_v2  ;;  %v266_v4 = vadd.s32 %v265_v1, %v263_v2  ;;  %s379_s28 = sshll.u32 %s971_s27, 4  ;;  %s989_s22 = scalar_lea.hbm %s1050_s2, %s529_s3  ;;  %s991_s28 = int_to_ptr.vmem [resolvable:$true] %s379_s28 }
  0x57   : > { %s686_s14 = scalar_lea.vmem %s991_s28, 1536  ;;  %s690_s4 = sshll.u32 %s800_s30, 4  ;;  %s691_s4 = int_to_ptr.vmem [resolvable:$false] %s690_s4 }
  0x58   : > { %v267_v5 = vadd.s32 %v265_v1, %v264_v3  ;;  %vm268_vm0 = vcmp.lt.s32.totalorder %v266_v4, 16  ;;  %p687_p2 = scmp.ne.s32.totalorder %s991_s28, %s686_s14  ;;  %s692_s5 = scalar_lea.vmem %s691_s4, 3072 }
  0x59   : > { %vm272_vm5 = vmand %vm268_vm0, %vm270_vm2  ;;  %p693_p11 = scmp.lt.s32.totalorder %s991_s28, %s691_s4  ;;  %p694_p1 = scmp.lt.s32.totalorder %s692_s5, %s686_s14 }
  0x5a   : > { %vm269_vm1 = vcmp.lt.s32.totalorder %v267_v5, 16  ;;  %v286_v10 = vsel %vm272_vm5, %v258_v6, 0.0  ;;  %v497_v13 = vsel %vm272_vm5, 1.0, %v799_v12  ;;  %vm276_vm8 = vmand %vm268_vm0, %vm274_vm4  ;;  %p688_p9 = pnand %p687_p2, %p1061_p8 }
  0x5b   : > { %vm273_vm7 = vmand %vm269_vm1, %vm271_vm3  ;;  %v290_v15 = vmul.f32 %v286_v10, %v286_v10  ;;  %v288_v19 = vsel %vm276_vm8, %v260_v8, 0.0  ;;  %v499_v21 = vsel %vm276_vm8, 1.0, %v799_v12  ;;  %p695_p3 = por %p694_p1, %p693_p11 }
  0x5c   : > { %v287_v11 = vsel %vm273_vm7, %v259_v7, 0.0  ;;  %v498_v14 = vsel %vm273_vm7, 1.0, %v799_v12  ;;  %vm277_vm9 = vmand %vm269_vm1, %vm275_vm6  ;;  %v292_v23 = vmul.f32 %v288_v19, %v288_v19  ;;  %v294_v28 = vmul.f32 %v499_v21, %v497_v13  ;;  %p689_p10 = pneg %p688_p9 }
  0x5d   : > { %v306_v16 = vadd.f32 %v287_v11, %v286_v10  ;;  %v310_v17 = vadd.f32 %v498_v14, %v497_v13  ;;  %v291_v18 = vmul.f32 %v287_v11, %v287_v11  ;;  %v289_v20 = vsel %vm277_vm9, %v261_v9, 0.0 }
  0x5e   : > { %v500_v22 = vsel %vm277_vm9, 1.0, %v799_v12  ;;  %v320_v25 = vadd.f32 %v289_v20, %v288_v19  ;;  %v293_v27 = vmul.f32 %v289_v20, %v289_v20  ;;  %v296_v30 = vmul.f32 %v499_v21, %v286_v10  ;;  %p696_p7 = pnand %p695_p3, %p689_p10 }
  0x5f   : > { %v315_v24 = vadd.f32 %v291_v18, %v290_v15  ;;  %v325_v26 = vadd.f32 %v500_v22, %v499_v21  ;;  %v295_v29 = vmul.f32 %v500_v22, %v498_v14  ;;  %309 = vst [vmem:[%s971_s27] sm:$0xff] %v306_v16  ;;  %502 = vst [vmem:[%s971_s27 + $0x8] sm:$0xff] %v310_v17 }
  0x60   : > { %v297_v31 = vmul.f32 %v500_v22, %v287_v11  ;;  %v330_v32 = vadd.f32 %v293_v27, %v292_v23  ;;  %v298_v34 = vmul.f32 %v497_v13, %v288_v19  ;;  %506 = vst [vmem:[%s971_s27 + $0x18] sm:$0xff] %v320_v25  ;;  %v299_v36 = vmul.f32 %v498_v14, %v289_v20 }
  0x61   : > { %v335_v33 = vadd.f32 %v295_v29, %v294_v28  ;;  %504 = vst [vmem:[%s971_s27 + $0x10] sm:$0xff] %v315_v24  ;;  %v300_v37 = vmul.f32 %v288_v19, %v286_v10  ;;  %v301_v38 = vmul.f32 %v289_v20, %v287_v11  ;;  %508 = vst [vmem:[%s971_s27 + $0x20] sm:$0xff] %v325_v26 }
  0x62   : > { %v340_v35 = vadd.f32 %v297_v31, %v296_v30  ;;  %v302_v39 = vmul.f32 %v499_v21, %v290_v15  ;;  %v303_v40 = vmul.f32 %v500_v22, %v291_v18  ;;  %v345_v41 = vadd.f32 %v299_v36, %v298_v34  ;;  %510 = vst [vmem:[%s971_s27 + $0x28] sm:$0xff] %v330_v32 }
  0x63   : > { %v350_v42 = vadd.f32 %v301_v38, %v300_v37  ;;  %v304_v43 = vmul.f32 %v497_v13, %v292_v23  ;;  %512 = vst [vmem:[%s971_s27 + $0x30] sm:$0xff] %v335_v33  ;;  %v305_v45 = vmul.f32 %v498_v14, %v293_v27 }
  0x64   : > { %v355_v44 = vadd.f32 %v303_v40, %v302_v39  ;;  %514 = vst [vmem:[%s971_s27 + $0x38] sm:$0xff] %v340_v35  ;;  %516 = vst [vmem:[%s971_s27 + $0x40] sm:$0xff] %v345_v41 }
  0x65   : > { %v360_v46 = vadd.f32 %v305_v45, %v304_v43  ;;  %518 = vst [vmem:[%s971_s27 + $0x48] sm:$0xff] %v350_v42 }
  0x66   : > { %520 = vst [vmem:[%s971_s27 + $0x50] sm:$0xff] %v355_v44 }
  0x67   : > { %522 = vst [vmem:[%s971_s27 + $0x58] sm:$0xff] %v360_v46 }
  0x68   : > { %699 = shalt.err (!%p696_p7)
}
  0x69   : > { %s700_s6 = scalar_lea.hbm %s989_s22, 1536  ;;  %s704_s8 = scalar_lea.hbm %s1050_s2, 3072 }
  0x6a   : > { %p701_p13 = scmp.ne.s32.totalorder %s989_s22, %s700_s6  ;;  %p705_p12 = scmp.lt.u32.totalorder %s989_s22, %s1050_s2 }
  0x6b   : > { %p706_p0 = scmp.lt.u32.totalorder %s704_s8, %s700_s6  ;;  %p708_p2 = scmp.lt.u32.totalorder %s700_s6, %s989_s22 }
  0x6c   : > { %p702_p4 = pnand %p701_p13, %p1061_p8 }
  0x6d   : > { %p707_p5 = por %p706_p0, %p705_p12 }
  0x6e   : > { %p703_p6 = pneg %p702_p4 }
  0x6f   : > { %p709_p9 = por %p708_p2, %p707_p5 }
  0x71   : > { %p710_p10 = pnand %p709_p9, %p703_p6 }
  0x73   : > { %713 = shalt.err (!%p710_p10)
}
  0x74   : > { %s801_s21 = smov 128   ;;  %s802_s27 = smov 8  }
  0x75   : > { %534 = dma.vmem_to_hbm [thread:$0]  (%p1061_p8), %s991_s28, 1536, %s989_s22, %s996_s23, %s801_s21, %s801_s21, %s802_s27  }
  0x76 PF: > { %s394_s3 = sand.u32 1, %s765_s9   ;;  %p1062_p11 = scmp.ne.s32.totalorder %s1056_s26, 0 }
  0x77   : > { %p1063_p1 = scmp.ge.s32.totalorder %s793_s16, 2  ;;  %s395_s12 = scalar_lea.sflag [#allocation4], %s394_s3 }
  0x79   : > { %p544_p3 = pnand %p1063_p1, %p1062_p11 }
  0x7b   : > { %759 = dma.done.wait (!%p544_p3), %s395_s12, 1536  }
  0x7c   : > { %761 = vsyncadd (!%p544_p3), %s395_s12, 4294965760  ;;  %s21_s16 = sadd.s32 1, %s793_s16   ;;  %s1064_s9 = smov %s769_s10 }
  0x7d   : > { %p18_p7 = scmp.ge.s32.totalorder %s21_s16, 4   ;;  %s1065_s10 = smov %s773_s11 }
  0x7e   : > { %s1066_s11 = smov %s876_s24  ;;  %s1067_s12 = smov %s781_s13 }
  0x7f   : > { %s1038_s13 = smov 0   ;;  %s1068_s14 = smov %s789_s15 }
  0x80   : > { %s1069_s15 = smov %s1071_s19  ;;  %20 = sbr.rel (!%p18_p7) target bundleno = 9 (0x9), region = 101 }
  0x87   :  { %400 = vsyncpa [#allocation3], 1 }
  0x88   :  { %402 = vsyncpa [#allocation3 + $0x1], 1 }
  0x89   :  { %403 = vsyncpa [#allocation6], 1 }
  0x8a   :  { %405 = vsyncpa [#allocation6 + $0x1], 1 }
  0x8b   :  { %406 = vsyncpa [#allocation4], 1 }
  0x8c   :  { %408 = vsyncpa [#allocation4 + $0x1], 1 }

</bundles_post_ra>
